<compile_context>
chip_gen: v5e
topology: v5e:2x2
jax: 0.10.0
libtpu: 0.0.40
codegen_flags: <defaults>
</compile_context>

<pallas_src>
import functools
import math

import jax
import jax.numpy as jnp
from jax.experimental import pallas as pl
from jax.experimental.pallas import tpu as pltpu

ACT_DTYPE = jnp.bfloat16  # inter-kernel activation dtype

VMEM_SPEC = pl.BlockSpec(memory_space=pltpu.MemorySpace.VMEM)
SMEM_SPEC = pl.BlockSpec(memory_space=pltpu.MemorySpace.SMEM)

# Matmul tile targets (clamped to the actual problem size); sized so that
# double-buffered x/w/out tiles + f32 accumulator stay well under v7x's
# 32 MiB scoped VMEM while keeping the MXU fed on v5e/v6e as well.
TM, TN, TK = 512, 256, 512


def _round_up(v, m):
    return ((v + m - 1) // m) * m


def _vmem_limit_bytes():
    """Per-generation scoped-VMEM budget (v7x: 64 MiB physical, v5e/v6e: 128 MiB)."""
    try:
        cap = int(pltpu.get_tpu_info().vmem_capacity_bytes)
        if cap <= 0:
            return None
        return int(min(cap * 3 // 4, 96 * 1024 * 1024))
    except Exception:
        return None


_VMEM_LIMIT = _vmem_limit_bytes()


def _cparams(*sem):
    return pltpu.CompilerParams(dimension_semantics=sem,
                                vmem_limit_bytes=_VMEM_LIMIT)


# ----------------------------- Pallas kernels ------------------------------

def _matmul_bn_kernel(relu, x_ref, w_ref, s_ref, b_ref, o_ref, acc_ref):
    """Tiled o = [relu]((x @ w) * scale + bias); bf16 MXU inputs, f32 accumulate."""
    @pl.when(pl.program_id(2) == 0)
    def _init():
        acc_ref[...] = jnp.zeros_like(acc_ref)

    acc_ref[...] += jnp.dot(x_ref[...], w_ref[...],
                            preferred_element_type=jnp.float32)

    @pl.when(pl.program_id(2) == pl.num_programs(2) - 1)
    def _fini():
        y = acc_ref[...] * s_ref[...] + b_ref[...]
        if relu:
            y = jnp.maximum(y, 0.0)
        o_ref[...] = y.astype(o_ref.dtype)


def _conv3x3_s1_kernel(relu, x_ref, w_ref, s_ref, b_ref, o_ref):
    """Fused 3x3 stride-1 conv + folded BN (+ ReLU).

    x_ref: (1, H+2, W+2, Cin) zero-padded bf16 (one image per grid step)
    w_ref: (9*Cin, Cout) bf16, tap-major rows ((di*3+dj)*Cin + c)
    The 9 taps are accumulated as shifted-slice matmuls in-kernel, so no im2col
    patch tensor ever touches HBM.
    """
    _, hp, wp, cin = x_ref.shape
    h, w = hp - 2, wp - 2
    cout = o_ref.shape[-1]
    x = x_ref[0]
    acc = jnp.zeros((h * w, cout), jnp.float32)
    for di in range(3):
        for dj in range(3):
            patch = x[di:di + h, dj:dj + w, :].reshape(h * w, cin)
            wtap = w_ref[(di * 3 + dj) * cin:(di * 3 + dj + 1) * cin, :]
            acc = acc + jnp.dot(patch, wtap, preferred_element_type=jnp.float32)
    y = acc * s_ref[...] + b_ref[...]
    if relu:
        y = jnp.maximum(y, 0.0)
    o_ref[0] = y.reshape(h, w, cout).astype(o_ref.dtype)


def _maxpool_rowcol_kernel(x_ref, o_ref):
    """3x3/s2/p1 maxpool, fused.

    x_ref: (1, H+2, W+2, C) -inf padded.  Rows are reduced at stride 2 via a
    leading-dim regroup (no strided vector loads); columns are reduced by three
    contiguous shifts at full W resolution - the host slices [:, :, ::2, :].
    """
    _, hp, wp, c = x_ref.shape
    h, w = hp - 2, wp - 2
    ho = h // 2
    x = x_ref[0]
    xr = x.reshape(hp // 2, 2, wp, c)
    r0 = xr[:ho, 0]           # rows 2r
    r1 = xr[:ho, 1]           # rows 2r + 1
    r2 = xr[1:ho + 1, 0]      # rows 2r + 2
    rm = jnp.maximum(jnp.maximum(r0, r1), r2)                      # (ho, wp, c)
    cm = jnp.maximum(jnp.maximum(rm[:, 0:w], rm[:, 1:w + 1]), rm[:, 2:w + 2])
    o_ref[0] = cm


def _sa_residual_kernel(x_ref, id_ref, w_ref, o_ref):
    """Fused SpatialAttention + residual + ReLU for one image.

    Channel mean/max of conv3's output, 7x7 attention conv as a VPU weighted
    sum of shifted planes (weights are SMEM scalars), sigmoid via EUP exp +
    approx reciprocal, then relu(sigmoid(att) * out + identity).
    """
    _, h, w, c = x_ref.shape
    x = x_ref[0].astype(jnp.float32)                   # (H, W, C)
    avg = jnp.mean(x, axis=-1)                         # (H, W)
    mx = jnp.max(x, axis=-1)                           # (H, W)

    def pad3(p):
        zc = jnp.zeros((h, 3), jnp.float32)
        p = jnp.concatenate([zc, p, zc], axis=1)
        zr = jnp.zeros((3, w + 6), jnp.float32)
        return jnp.concatenate([zr, p, zr], axis=0)    # (H+6, W+6)

    avg_p = pad3(avg)
    mx_p = pad3(mx)
    logit = jnp.zeros((h, w), jnp.float32)
    for di in range(7):
        for dj in range(7):
            logit = logit + w_ref[di * 7 + dj] * avg_p[di:di + h, dj:dj + w]
            logit = logit + w_ref[49 + di * 7 + dj] * mx_p[di:di + h, dj:dj + w]
    att = pl.reciprocal(1.0 + jnp.exp(-logit), approx=True)        # sigmoid
    y = jnp.maximum(att[:, :, None] * x + id_ref[0].astype(jnp.float32), 0.0)
    o_ref[0] = y.astype(o_ref.dtype)


def _gap_bn_kernel(use_max, x_ref, s_ref, b_ref, feat_ref, emb_ref):
    """Global spatial pool over (B, HW, C) + eval-mode BatchNorm1d."""
    x = x_ref[...].astype(jnp.float32)
    feat = jnp.max(x, axis=1) if use_max else jnp.mean(x, axis=1)
    feat_ref[...] = feat
    emb_ref[...] = feat * s_ref[...] + b_ref[...]


# ------------------------------- Wrappers -----------------------------------

def matmul_bn(x, w, scale, bias, relu, out_dtype=ACT_DTYPE):
    """Grid-tiled bf16 matmul with fused folded-BN affine (+ ReLU)."""
    m, k = x.shape
    n = w.shape[1]
    tm = min(TM, _round_up(m, 8))
    tn = min(TN, _round_up(n, 128))
    tk = min(TK, _round_up(k, 128))
    mp, kp, np_ = _round_up(m, tm), _round_up(k, tk), _round_up(n, tn)
    xp = jnp.pad(x.astype(jnp.bfloat16), ((0, mp - m), (0, kp - k)))
    wp = jnp.pad(w.astype(jnp.bfloat16), ((0, kp - k), (0, np_ - n)))
    sp = jnp.pad(scale.astype(jnp.float32), ((0, 0), (0, np_ - n)))
    bp = jnp.pad(bias.astype(jnp.float32), ((0, 0), (0, np_ - n)))
    out = pl.pallas_call(
        functools.partial(_matmul_bn_kernel, relu),
        out_shape=jax.ShapeDtypeStruct((mp, np_), out_dtype),
        grid_spec=pltpu.PrefetchScalarGridSpec(
            num_scalar_prefetch=0,
            grid=(mp // tm, np_ // tn, kp // tk),
            in_specs=[
                pl.BlockSpec((tm, tk), lambda i, j, kk: (i, kk)),
                pl.BlockSpec((tk, tn), lambda i, j, kk: (kk, j)),
                pl.BlockSpec((1, tn), lambda i, j, kk: (0, j)),
                pl.BlockSpec((1, tn), lambda i, j, kk: (0, j)),
            ],
            out_specs=pl.BlockSpec((tm, tn), lambda i, j, kk: (i, j)),
            scratch_shapes=[pltpu.VMEM((tm, tn), jnp.float32)],
        ),
        compiler_params=_cparams("parallel", "parallel", "arbitrary"),
    )(xp, wp, sp, bp)
    return out[:m, :n]


def conv1x1_bn(x, w, bn, relu, stride=1):
    """1x1 conv (no bias) + folded BN (+ ReLU): no im2col, just a tiled matmul."""
    if stride > 1:
        x = x[:, ::stride, ::stride, :]
    b, h, wd, cin = x.shape
    cout = w.shape[1]
    y = matmul_bn(x.reshape(b * h * wd, cin), w, bn[0], bn[1], relu)
    return y.reshape(b, h, wd, cout)


def conv3x3_s1_bn(x, w, bn, relu):
    """3x3 stride-1 conv + folded BN (+ ReLU) via the fused tap kernel."""
    b, h, wd, cin = x.shape
    cout = w.shape[1]
    xp = jnp.pad(x, ((0, 0), (1, 1), (1, 1), (0, 0)))
    return pl.pallas_call(
        functools.partial(_conv3x3_s1_kernel, relu),
        out_shape=jax.ShapeDtypeStruct((b, h, wd, cout), ACT_DTYPE),
        grid=(b,),
        in_specs=[
            pl.BlockSpec((1, h + 2, wd + 2, cin), lambda i: (i, 0, 0, 0)),
            pl.BlockSpec((9 * cin, cout), lambda i: (0, 0)),
            pl.BlockSpec((1, cout), lambda i: (0, 0)),
            pl.BlockSpec((1, cout), lambda i: (0, 0)),
        ],
        out_specs=pl.BlockSpec((1, h, wd, cout), lambda i: (i, 0, 0, 0)),
        compiler_params=_cparams("parallel"),
    )(xp, w.astype(jnp.bfloat16), bn[0], bn[1])


def _im2col(x, k, stride, padding):
    """x: (B,H,W,C) -> patches (B*Ho*Wo, k*k*C), torch (ki,kj,cin) ordering.

    Only used for the stride-2 spatial convs (stem 7x7 + three 3x3 s2 convs).
    """
    b, h, w, c = x.shape
    ho = (h + 2 * padding - k) // stride + 1
    wo = (w + 2 * padding - k) // stride + 1
    if padding:
        x = jnp.pad(x, ((0, 0), (padding, padding), (padding, padding), (0, 0)))
    taps = []
    for di in range(k):
        for dj in range(k):
            taps.append(x[:, di:di + stride * ho:stride, dj:dj + stride * wo:stride, :])
    p = jnp.stack(taps, axis=3).reshape(b * ho * wo, k * k * c)
    return p, (b, ho, wo)


def conv_im2col_bn(x, w, bn, k, stride, padding, relu):
    p, (b, ho, wo) = _im2col(x, k, stride, padding)
    cout = w.shape[1]
    y = matmul_bn(p, w, bn[0], bn[1], relu)
    return y.reshape(b, ho, wo, cout)


def maxpool_3x3_s2_p1(x):
    b, h, w, c = x.shape
    assert h % 2 == 0 and w % 2 == 0
    ho, wo = h // 2, w // 2
    xp = jnp.pad(x, ((0, 0), (1, 1), (1, 1), (0, 0)), constant_values=-jnp.inf)
    full = pl.pallas_call(
        _maxpool_rowcol_kernel,
        out_shape=jax.ShapeDtypeStruct((b, ho, w, c), x.dtype),
        grid=(b,),
        in_specs=[pl.BlockSpec((1, h + 2, w + 2, c), lambda i: (i, 0, 0, 0))],
        out_specs=pl.BlockSpec((1, ho, w, c), lambda i: (i, 0, 0, 0)),
        compiler_params=_cparams("parallel"),
    )(xp)
    return full[:, :, ::2, :]  # column stride-2 subsample (cheap XLA slice)


def sa_residual(out_map, identity, w_sa):
    b, h, w, c = out_map.shape
    return pl.pallas_call(
        _sa_residual_kernel,
        out_shape=jax.ShapeDtypeStruct((b, h, w, c), ACT_DTYPE),
        grid=(b,),
        in_specs=[
            pl.BlockSpec((1, h, w, c), lambda i: (i, 0, 0, 0)),
            pl.BlockSpec((1, h, w, c), lambda i: (i, 0, 0, 0)),
            SMEM_SPEC,
        ],
        out_specs=pl.BlockSpec((1, h, w, c), lambda i: (i, 0, 0, 0)),
        compiler_params=_cparams("parallel"),
    )(out_map, identity, w_sa)


def gap_bn1d(fmap, scale, bias, last_pooling='avg'):
    b, h, w, c = fmap.shape
    x = fmap.reshape(b, h * w, c)
    feat, emb = pl.pallas_call(
        functools.partial(_gap_bn_kernel, last_pooling == 'max'),
        out_shape=(jax.ShapeDtypeStruct((b, c), jnp.float32),
                   jax.ShapeDtypeStruct((b, c), jnp.float32)),
        in_specs=[VMEM_SPEC] * 3,
        out_specs=(VMEM_SPEC, VMEM_SPEC),
    )(x, scale, bias)
    return feat, emb


# ------------------------------ Parameters ----------------------------------

def _kaiming_conv2d(key, cout, cin, k):
    """kaiming_normal_(fan_out, relu) weight, stored as (k*k*cin, cout)."""
    std = math.sqrt(2.0 / (cout * k * k))
    w = jax.random.normal(key, (cout, cin, k, k), jnp.float32) * std
    return jnp.transpose(w, (2, 3, 1, 0)).reshape(k * k * cin, cout)


def _kaiming_sa(key):
    """SpatialAttention 7x7 (2->1) conv, flattened (2*49,): idx = c*49 + di*7 + dj."""
    std = math.sqrt(2.0 / (1 * 7 * 7))
    w = jax.random.normal(key, (1, 2, 7, 7), jnp.float32) * std
    return w[0].reshape(-1)


def _bn_fold(c, eps=1e-5):
    """Eval-mode BatchNorm fold: gamma=1, beta=0, running_mean=0, running_var=1."""
    gamma = jnp.ones((c,), jnp.float32)
    beta = jnp.zeros((c,), jnp.float32)
    mean = jnp.zeros((c,), jnp.float32)
    var = jnp.ones((c,), jnp.float32)
    scale = gamma / jnp.sqrt(var + eps)
    bias = beta - mean * scale
    return scale.reshape(1, c), bias.reshape(1, c)


def make_params(key, layers=(3, 4, 6, 3), last_stride=2):
    keys = iter(jax.random.split(key, 256))
    params = {'conv1': _kaiming_conv2d(next(keys), 64, 3, 7), 'bn1': _bn_fold(64)}
    inplanes = 64
    plane_list = (64, 128, 256, 512)
    stride_list = (1, 2, 2, last_stride)
    all_layers = []
    for planes, nblocks, stride in zip(plane_list, layers, stride_list):
        blocks = []
        for bi in range(nblocks):
            s = stride if bi == 0 else 1
            need_ds = (bi == 0) and (s != 1 or inplanes != planes * 4)
            width = planes  # groups=1, base_width=64
            p = {'stride': s,
                 'conv1': _kaiming_conv2d(next(keys), width, inplanes, 1),
                 'bn1': _bn_fold(width),
                 'conv2': _kaiming_conv2d(next(keys), width, width, 3),
                 'bn2': _bn_fold(width),
                 'conv3': _kaiming_conv2d(next(keys), planes * 4, width, 1),
                 'bn3': _bn_fold(planes * 4),
                 'sa_w': _kaiming_sa(next(keys))}
            # ChannelAttention ('ca') exists in the torch module but is unused
            # in Bottleneck.forward() -> not materialized.
            if need_ds:
                p['ds_conv'] = _kaiming_conv2d(next(keys), planes * 4, inplanes, 1)
                p['ds_bn'] = _bn_fold(planes * 4)
            blocks.append(p)
            inplanes = planes * 4
        all_layers.append(blocks)
    params['layers'] = all_layers
    params['bn1d'] = _bn_fold(512 * 4)  # embedding = 2048 (see header note)
    return params


# -------------------------------- Forward -----------------------------------

def bottleneck(x, p):
    s = p['stride']
    out = conv1x1_bn(x, p['conv1'], p['bn1'], relu=True)
    if s == 1:
        out = conv3x3_s1_bn(out, p['conv2'], p['bn2'], relu=True)
    else:
        out = conv_im2col_bn(out, p['conv2'], p['bn2'], k=3, stride=s, padding=1,
                             relu=True)
    out = conv1x1_bn(out, p['conv3'], p['bn3'], relu=False)
    if 'ds_conv' in p:
        identity = conv1x1_bn(x, p['ds_conv'], p['ds_bn'], relu=False, stride=s)
    else:
        identity = x
    return sa_residual(out, identity, p['sa_w'])


def resnet_cbam_forward(x_nchw, params, last_pooling='avg'):
    x = jnp.transpose(x_nchw, (0, 2, 3, 1)).astype(ACT_DTYPE)  # NCHW -> NHWC bf16
    x = conv_im2col_bn(x, params['conv1'], params['bn1'], k=7, stride=2, padding=3,
                       relu=True)
    x = maxpool_3x3_s2_p1(x)
    maps = []
    for blocks in params['layers']:
        for blk in blocks:
            x = bottleneck(x, blk)
        maps.append(x)
    scale, bias = params['bn1d']
    feat, emb = gap_bn1d(maps[-1], scale, bias, last_pooling)
    return {
        'embedding': emb,
        'global': feat,
        'maps': [jnp.transpose(m, (0, 3, 1, 2)).astype(jnp.float32) for m in maps],
    }


if __name__ == "__main__":
    key = jax.random.PRNGKey(0)
    pkey, xkey = jax.random.split(key)
    params = make_params(pkey, layers=(3, 4, 6, 3), last_stride=2)
    # Small input consistent with the module: NCHW, 3 input channels.
    x = jax.random.normal(xkey, (2, 3, 32, 32), jnp.float32)
    out = resnet_cbam_forward(x, params, last_pooling='avg')
    out = jax.block_until_ready(out)
    assert out['embedding'].shape == (2, 2048)
    assert out['global'].shape == (2, 2048)
    assert [tuple(m.shape) for m in out['maps']] == [
        (2, 256, 8, 8), (2, 512, 4, 4), (2, 1024, 2, 2), (2, 2048, 1, 1)]
    print("KERNEL_OK")
</pallas_src>

<mosaic_0001>
module attributes {stable_mosaic.version = 11 : i64} {
  func.func @_matmul_bn_kernel(%arg0: i32, %arg1: i32, %arg2: i32, %arg3: memref<512x256xbf16, #tpu.memory_space<vmem>>, %arg4: memref<256x128xbf16, #tpu.memory_space<vmem>>, %arg5: memref<1x128xf32, #tpu.memory_space<vmem>>, %arg6: memref<1x128xf32, #tpu.memory_space<vmem>>, %arg7: memref<512x128xbf16, #tpu.memory_space<vmem>>, %arg8: memref<512x128xf32, #tpu.memory_space<vmem>>) attributes {dimension_semantics = [#tpu.dimension_semantics<parallel>, #tpu.dimension_semantics<parallel>, #tpu.dimension_semantics<arbitrary>], iteration_bounds = array<i64: 1, 1, 1>, scalar_prefetch = 0 : i64, scratch_operands = 1 : i64, tpu.core_type = #tpu.core_type<tc>, window_params = [{transform_indices = @transform_0, window_bounds = array<i64: 512, 256>}, {transform_indices = @transform_1, window_bounds = array<i64: 256, 128>}, {transform_indices = @transform_2, window_bounds = array<i64: 1, 128>}, {transform_indices = @transform_3, window_bounds = array<i64: 1, 128>}, {transform_indices = @transform_4, window_bounds = array<i64: 512, 128>}]} {
    %c0_i32 = arith.constant 0 : i32
    %0 = arith.cmpi eq, %arg2, %c0_i32 : i32
    %1 = arith.extui %0 : i1 to i32
    %c0_i32_0 = arith.constant 0 : i32
    %2 = arith.cmpi ne, %1, %c0_i32_0 : i32
    scf.if %2 {
      %cst_10 = arith.constant 0.000000e+00 : f32
      %12 = vector.broadcast %cst_10 : f32 to vector<512x128xf32>
      %c0_11 = arith.constant 0 : index
      %c0_12 = arith.constant 0 : index
      %13 = vector.load %arg8[%c0_11, %c0_12] : memref<512x128xf32, #tpu.memory_space<vmem>>, vector<512x128xf32>
      tpu.vector_store %arg8[%c0_11, %c0_12], %12 {strides = array<i32>} : memref<512x128xf32, #tpu.memory_space<vmem>>, vector<512x128xf32>,
    } else {
    }
    %c0 = arith.constant 0 : index
    %c0_1 = arith.constant 0 : index
    %3 = vector.load %arg8[%c0, %c0_1] : memref<512x128xf32, #tpu.memory_space<vmem>>, vector<512x128xf32>
    %c0_2 = arith.constant 0 : index
    %c0_3 = arith.constant 0 : index
    %4 = vector.load %arg3[%c0_2, %c0_3] : memref<512x256xbf16, #tpu.memory_space<vmem>>, vector<512x256xbf16>
    %c0_4 = arith.constant 0 : index
    %c0_5 = arith.constant 0 : index
    %5 = vector.load %arg4[%c0_4, %c0_5] : memref<256x128xbf16, #tpu.memory_space<vmem>>, vector<256x128xbf16>
    %cst = arith.constant dense<0.000000e+00> : vector<512x128xf32>
    %6 = tpu.matmul %4, %5, %cst {dimension_numbers = #tpu.dot_dimension_numbers<[1], [0], [0], [1], [0, 0, 1, 1], [], []>} : vector<512x256xbf16>, vector<256x128xbf16>, vector<512x128xf32> -> vector<512x128xf32>
    %7 = arith.addf %3, %6 : vector<512x128xf32>
    %c0_6 = arith.constant 0 : index
    %c0_7 = arith.constant 0 : index
    %8 = vector.load %arg8[%c0_6, %c0_7] : memref<512x128xf32, #tpu.memory_space<vmem>>, vector<512x128xf32>
    tpu.vector_store %arg8[%c0_6, %c0_7], %7 {strides = array<i32>} : memref<512x128xf32, #tpu.memory_space<vmem>>, vector<512x128xf32>,
    %c0_i32_8 = arith.constant 0 : i32
    %9 = arith.cmpi eq, %arg2, %c0_i32_8 : i32
    %10 = arith.extui %9 : i1 to i32
    %c0_i32_9 = arith.constant 0 : i32
    %11 = arith.cmpi ne, %10, %c0_i32_9 : i32
    scf.if %11 {
      %c0_10 = arith.constant 0 : index
      %c0_11 = arith.constant 0 : index
      %12 = vector.load %arg8[%c0_10, %c0_11] : memref<512x128xf32, #tpu.memory_space<vmem>>, vector<512x128xf32>
      %c0_12 = arith.constant 0 : index
      %c0_13 = arith.constant 0 : index
      %13 = vector.load %arg5[%c0_12, %c0_13] : memref<1x128xf32, #tpu.memory_space<vmem>>, vector<1x128xf32>
      %14 = vector.broadcast %13 : vector<1x128xf32> to vector<512x128xf32>
      %15 = arith.mulf %12, %14 : vector<512x128xf32>
      %c0_14 = arith.constant 0 : index
      %c0_15 = arith.constant 0 : index
      %16 = vector.load %arg6[%c0_14, %c0_15] : memref<1x128xf32, #tpu.memory_space<vmem>>, vector<1x128xf32>
      %17 = vector.broadcast %16 : vector<1x128xf32> to vector<512x128xf32>
      %18 = arith.addf %15, %17 : vector<512x128xf32>
      %cst_16 = arith.constant 0.000000e+00 : f32
      %19 = vector.broadcast %cst_16 : f32 to vector<512x128xf32>
      %20 = arith.maximumf %18, %19 : vector<512x128xf32>
      %21 = arith.truncf %20 : vector<512x128xf32> to vector<512x128xbf16>
      %c0_17 = arith.constant 0 : index
      %c0_18 = arith.constant 0 : index
      %22 = vector.load %arg7[%c0_17, %c0_18] : memref<512x128xbf16, #tpu.memory_space<vmem>>, vector<512x128xbf16>
      tpu.vector_store %arg7[%c0_17, %c0_18], %21 {strides = array<i32>} : memref<512x128xbf16, #tpu.memory_space<vmem>>, vector<512x128xbf16>,
    } else {
    }
    return
  }
  func.func @transform_0(%arg0: i32, %arg1: i32, %arg2: i32) -> (i32, i32) {
    %c0_i32 = arith.constant 0 : i32
    return %arg0, %arg2 : i32, i32
  }
  func.func @transform_1(%arg0: i32, %arg1: i32, %arg2: i32) -> (i32, i32) {
    %c0_i32 = arith.constant 0 : i32
    return %arg2, %arg1 : i32, i32
  }
  func.func @transform_2(%arg0: i32, %arg1: i32, %arg2: i32) -> (i32, i32) {
    %c0_i32 = arith.constant 0 : i32
    %c0_i32_0 = arith.constant 0 : i32
    return %c0_i32, %arg1 : i32, i32
  }
  func.func @transform_3(%arg0: i32, %arg1: i32, %arg2: i32) -> (i32, i32) {
    %c0_i32 = arith.constant 0 : i32
    %c0_i32_0 = arith.constant 0 : i32
    return %c0_i32, %arg1 : i32, i32
  }
  func.func @transform_4(%arg0: i32, %arg1: i32, %arg2: i32) -> (i32, i32) {
    %c0_i32 = arith.constant 0 : i32
    return %arg0, %arg1 : i32, i32
  }
}

</mosaic_0001>

<bundles_post_ra>
// kernel: tpu_custom_call.1
= control target key start
LH: loop header
LB: loop body
LE: loop exit
PB: predicated region body
PF: predicated region fallthrough
CT: control target
= control target key end

     0   :  { %9 = vsyncpa [#allocation4], 0  ;;  %s2448_s0 = inlined_call_operand.hbm [shape: bf16[512,256], index: 0, kind: input, shape index: {}]   ;;  %s2449_s1 = inlined_call_operand.hbm [shape: bf16[256,128], index: 1, kind: input, shape index: {}]   ;;  %s2450_s2 = inlined_call_operand.vmem [shape: f32[1,128], index: 2, kind: input, shape index: {}]   ;;  %s2451_s3 = inlined_call_operand.vmem [shape: f32[1,128], index: 3, kind: input, shape index: {}]   ;;  %s2452_s4 = inlined_call_operand.hbm [shape: bf16[512,128], index: 4, kind: output, shape index: {}]  }
   0x1   :  { %10 = vsyncpa [#allocation7], 0 }
   0x2   :  { %11 = vsyncpa [#allocation5], 0  ;;  %s16_s17 = sshll.u32 %s2448_s0, 4  ;;  %s2271_s18 = smov [#allocation3]   ;;  %s17_s17 = int_to_ptr.hbm [resolvable:$true] %s16_s17 }
   0x3   :  { %s18_s19 = sshll.u32 %s2271_s18, 4  ;;  %s29_s22 = sshll.u32 %s2449_s1, 4  ;;  %s19_s19 = int_to_ptr.vmem [resolvable:$true] %s18_s19  ;;  %s30_s22 = int_to_ptr.hbm [resolvable:$true] %s29_s22 }
   0x4   :  { %s2272_s23 = smov 128   ;;  %s2273_s24 = smov 8  }
   0x5   :  { %24 = dma.hbm_to_vmem [thread:$0]  %s17_s17, 8192, %s19_s19, [#allocation4], %s2272_s23, %s2272_s23, %s2273_s24  }
   0x6   :  { %s2274_s25 = smov [#allocation6]   ;;  %s2275_s27 = smov 64  }
   0x7   :  { %s31_s26 = sshll.u32 %s2274_s25, 4  ;;  %s2276_s28 = smov 4   ;;  %s32_s26 = int_to_ptr.vmem [resolvable:$true] %s31_s26 }
   0x8   :  { %37 = dma.hbm_to_vmem [thread:$0]  %s30_s22, 2048, %s32_s26, [#allocation7], %s2275_s27, %s2275_s27, %s2276_s28  }
   0x9   :  { %2265 = dma.done.wait [#allocation4], 8192  }
   0xa   :  { %2266 = vsyncadd [#allocation4], 4294959104 }
   0xb   :  { %2267 = dma.done.wait [#allocation7], 2048  }
   0xc   :  { %2268 = vsyncadd [#allocation7], 4294965248  ;;  %v1966_v0 = vld [vmem:[#allocation6 + $0x38] sm:$0xff]  ;;  %v1965_v2 = vld [vmem:[#allocation6 + $0x30] sm:$0xff]  ;;  %s1561_s11 = sshll.u32 %s2452_s4, 4  ;;  %s1562_s11 = int_to_ptr.hbm [resolvable:$true] %s1561_s11 }
   0xd   :  { %v1974_v1 = vld [vmem:[#allocation6 + $0x78] sm:$0xff]  ;;  %694 = vmatpush.bf16.msra.mxu0 %v1966_v0  ;;  %2166 = vmatpush.bf16.msra.mxu2 %v1966_v0  ;;  %v1973_v3 = vld [vmem:[#allocation6 + $0x70] sm:$0xff]  ;;  %v1964_v4 = vld [vmem:[#allocation6 + $0x28] sm:$0xff] }
   0xe   :  { %863 = vmatpush.bf16.msra.mxu1 %v1974_v1  ;;  %2174 = vmatpush.bf16.msra.mxu3 %v1974_v1  ;;  %v1972_v5 = vld [vmem:[#allocation6 + $0x68] sm:$0xff]  ;;  %v1963_v6 = vld [vmem:[#allocation6 + $0x20] sm:$0xff]  ;;  %v1962_v8 = vld [vmem:[#allocation6 + $0x18] sm:$0xff] }
   0xf   :  { %v1971_v7 = vld [vmem:[#allocation6 + $0x60] sm:$0xff]  ;;  %v1970_v9 = vld [vmem:[#allocation6 + $0x58] sm:$0xff]  ;;  %v1961_v10 = vld [vmem:[#allocation6 + $0x10] sm:$0xff] }
  0x10   :  { %v1969_v11 = vld [vmem:[#allocation6 + $0x50] sm:$0xff]  ;;  %v1960_v12 = vld [vmem:[#allocation6 + $0x8] sm:$0xff]  ;;  %v1959_v14 = vld [vmem:[#allocation6] sm:$0xff] }
  0x11   :  { %695 = vmatpush.bf16.msra.mxu0 %v1965_v2  ;;  %2167 = vmatpush.bf16.msra.mxu2 %v1965_v2  ;;  %v1968_v13 = vld [vmem:[#allocation6 + $0x48] sm:$0xff]  ;;  %v1967_v15 = vld [vmem:[#allocation6 + $0x40] sm:$0xff]  ;;  %v1585_v28 = vld [vmem:[#allocation3 + $0x10] sm:$0xf] }
  0x12   :  { %864 = vmatpush.bf16.msra.mxu1 %v1973_v3  ;;  %2175 = vmatpush.bf16.msra.mxu3 %v1973_v3  ;;  %v1577_v16 = vld [vmem:[#allocation3] sm:$0xf]  ;;  %v1896_v17 = vld [vmem:[#allocation3 + $0x4] sm:$0xf0]  ;;  %v1895_v20 = vld [vmem:[#allocation3 + $0x4] sm:$0xf] }
  0x13   :  { %v1705_v18 = vld [vmem:[#allocation3 + $0x100] sm:$0xf]  ;;  %v1928_v19 = vld [vmem:[#allocation3 + $0x104] sm:$0xf0]  ;;  %v1579_v21 = vld [vmem:[#allocation3 + $0x8] sm:$0xf0]  ;;  %v1578_v24 = vor.u32 %v1896_v17, %v1577_v16 }
  0x14   :  { %v1927_v22 = vld [vmem:[#allocation3 + $0x104] sm:$0xf]  ;;  %v1707_v23 = vld [vmem:[#allocation3 + $0x108] sm:$0xf0]  ;;  %v1706_v25 = vor.u32 %v1928_v19, %v1705_v18  ;;  %v1582_v26 = vor.u32 %v1895_v20, %v1579_v21  ;;  %v1898_v29 = vld [vmem:[#allocation3 + $0x14] sm:$0xf0] }
  0x15   :  { %696 = vmatpush.bf16.msra.mxu0 %v1964_v4  ;;  %2168 = vmatpush.bf16.msra.mxu2 %v1964_v4  ;;  %v1710_v27 = vor.u32 %v1927_v22, %v1707_v23  ;;  %v1713_v30 = vld [vmem:[#allocation3 + $0x110] sm:$0xf]  ;;  %v1930_v31 = vld [vmem:[#allocation3 + $0x114] sm:$0xf0]  ;;  %v1897_v32 = vld [vmem:[#allocation3 + $0x14] sm:$0xf]  ;;  %v1586_v36 = vor.u32 %v1898_v29, %v1585_v28 }
  0x16   :  { %865 = vmatpush.bf16.msra.mxu1 %v1972_v5  ;;  %2176 = vmatpush.bf16.msra.mxu3 %v1972_v5  ;;  %v1587_v33 = vld [vmem:[#allocation3 + $0x18] sm:$0xf0]  ;;  %v1929_v34 = vld [vmem:[#allocation3 + $0x114] sm:$0xf]  ;;  %v1714_v37 = vor.u32 %v1930_v31, %v1713_v30  ;;  %v1593_v40 = vld [vmem:[#allocation3 + $0x20] sm:$0xf] }
  0x17   :  { %v1715_v35 = vld [vmem:[#allocation3 + $0x118] sm:$0xf0]  ;;  %v1590_v38 = vor.u32 %v1897_v32, %v1587_v33  ;;  %v1900_v41 = vld [vmem:[#allocation3 + $0x24] sm:$0xf0]  ;;  %v1721_v42 = vld [vmem:[#allocation3 + $0x120] sm:$0xf] }
  0x18   :  { %v1718_v39 = vor.u32 %v1929_v34, %v1715_v35  ;;  %v1932_v43 = vld [vmem:[#allocation3 + $0x124] sm:$0xf0]  ;;  %v1899_v44 = vld [vmem:[#allocation3 + $0x24] sm:$0xf]  ;;  %v1595_v45 = vld [vmem:[#allocation3 + $0x28] sm:$0xf0]  ;;  %v1594_v48 = vor.u32 %v1900_v41, %v1593_v40 }
  0x19   :  { %697 = vmatpush.bf16.msra.mxu0 %v1963_v6  ;;  %2169 = vmatpush.bf16.msra.mxu2 %v1963_v6  ;;  %v1931_v46 = vld [vmem:[#allocation3 + $0x124] sm:$0xf]  ;;  %v1723_v47 = vld [vmem:[#allocation3 + $0x128] sm:$0xf0]  ;;  %v1722_v49 = vor.u32 %v1932_v43, %v1721_v42  ;;  %v1598_v50 = vor.u32 %v1899_v44, %v1595_v45  ;;  %v1601_v52 = vld [vmem:[#allocation3 + $0x30] sm:$0xf] }
  0x1a   :  { %866 = vmatpush.bf16.msra.mxu1 %v1971_v7  ;;  %2177 = vmatpush.bf16.msra.mxu3 %v1971_v7  ;;  %v1726_v51 = vor.u32 %v1931_v46, %v1723_v47  ;;  %v1902_v53 = vld [vmem:[#allocation3 + $0x34] sm:$0xf0]  ;;  %v1729_v54 = vld [vmem:[#allocation3 + $0x130] sm:$0xf]  ;;  %v1901_v56 = vld [vmem:[#allocation3 + $0x34] sm:$0xf] }
  0x1b   :  { %v1934_v55 = vld [vmem:[#allocation3 + $0x134] sm:$0xf0]  ;;  %v1603_v57 = vld [vmem:[#allocation3 + $0x38] sm:$0xf0]  ;;  %v1933_v58 = vld [vmem:[#allocation3 + $0x134] sm:$0xf]  ;;  %v1602_v60 = vor.u32 %v1902_v53, %v1601_v52 }
  0x1c   :  { %v1731_v59 = vld [vmem:[#allocation3 + $0x138] sm:$0xf0]  ;;  %v1730_v61 = vor.u32 %v1934_v55, %v1729_v54  ;;  %v1606_v62 = vor.u32 %v1901_v56, %v1603_v57  ;;  %v1609_v0 = vld [vmem:[#allocation3 + $0x40] sm:$0xf]  ;;  %v1904_v1 = vld [vmem:[#allocation3 + $0x44] sm:$0xf0] }
  0x1d   :  { %698 = vmatpush.bf16.msra.mxu0 %v1962_v8  ;;  %2170 = vmatpush.bf16.msra.mxu2 %v1962_v8  ;;  %v1734_v63 = vor.u32 %v1933_v58, %v1731_v59  ;;  %v1737_v2 = vld [vmem:[#allocation3 + $0x140] sm:$0xf]  ;;  %v1936_v3 = vld [vmem:[#allocation3 + $0x144] sm:$0xf0]  ;;  %v1903_v4 = vld [vmem:[#allocation3 + $0x44] sm:$0xf]  ;;  %v1610_v8 = vor.u32 %v1904_v1, %v1609_v0 }
  0x1e   :  { %867 = vmatpush.bf16.msra.mxu1 %v1970_v9  ;;  %2178 = vmatpush.bf16.msra.mxu3 %v1970_v9  ;;  %v1611_v5 = vld [vmem:[#allocation3 + $0x48] sm:$0xf0]  ;;  %v1935_v6 = vld [vmem:[#allocation3 + $0x144] sm:$0xf]  ;;  %v1738_v9 = vor.u32 %v1936_v3, %v1737_v2  ;;  %v1905_v16 = vld [vmem:[#allocation3 + $0x54] sm:$0xf] }
  0x1f   :  { %v1739_v7 = vld [vmem:[#allocation3 + $0x148] sm:$0xf0]  ;;  %v1619_v17 = vld [vmem:[#allocation3 + $0x58] sm:$0xf0]  ;;  %v1937_v18 = vld [vmem:[#allocation3 + $0x154] sm:$0xf] }
  0x20   :  { %v1747_v19 = vld [vmem:[#allocation3 + $0x158] sm:$0xf0]  ;;  %v1622_v22 = vor.u32 %v1905_v16, %v1619_v17  ;;  %v1907_v28 = vld [vmem:[#allocation3 + $0x64] sm:$0xf]  ;;  %v1627_v29 = vld [vmem:[#allocation3 + $0x68] sm:$0xf0] }
  0x21   :  { %699 = vmatpush.bf16.msra.mxu0 %v1961_v10  ;;  %2171 = vmatpush.bf16.msra.mxu2 %v1961_v10  ;;  %v1614_v10 = vor.u32 %v1903_v4, %v1611_v5  ;;  %v1750_v23 = vor.u32 %v1937_v18, %v1747_v19  ;;  %v1939_v30 = vld [vmem:[#allocation3 + $0x164] sm:$0xf]  ;;  %v1755_v31 = vld [vmem:[#allocation3 + $0x168] sm:$0xf0]  ;;  %v1630_v34 = vor.u32 %v1907_v28, %v1627_v29  ;;  %v1909_v40 = vld [vmem:[#allocation3 + $0x74] sm:$0xf] }
  0x22   :  { %868 = vmatpush.bf16.msra.mxu1 %v1969_v11  ;;  %2179 = vmatpush.bf16.msra.mxu3 %v1969_v11  ;;  %v1742_v11 = vor.u32 %v1935_v6, %v1739_v7  ;;  %v1758_v35 = vor.u32 %v1939_v30, %v1755_v31  ;;  %v1635_v41 = vld [vmem:[#allocation3 + $0x78] sm:$0xf0]  ;;  %v1941_v42 = vld [vmem:[#allocation3 + $0x174] sm:$0xf]  ;;  %v1911_v52 = vld [vmem:[#allocation3 + $0x84] sm:$0xf] }
  0x23   :  { %v1763_v43 = vld [vmem:[#allocation3 + $0x178] sm:$0xf0]  ;;  %v1638_v46 = vor.u32 %v1909_v40, %v1635_v41  ;;  %v1643_v53 = vld [vmem:[#allocation3 + $0x88] sm:$0xf0]  ;;  %v1943_v54 = vld [vmem:[#allocation3 + $0x184] sm:$0xf] }
  0x24   :  { %v1766_v47 = vor.u32 %v1941_v42, %v1763_v43  ;;  %v1771_v55 = vld [vmem:[#allocation3 + $0x188] sm:$0xf0]  ;;  %v1646_v59 = vor.u32 %v1911_v52, %v1643_v53  ;;  %v2321_v3 = vld [vmem:[%s2451_s3] ss:$0 sm:$0xff]  ;;  %v1945_v16 = vld [vmem:[#allocation3 + $0x194] sm:$0xf] }
  0x25   :  { %700 = vmatpush.bf16.msra.mxu0 %v1960_v12  ;;  %2172 = vmatpush.bf16.msra.mxu2 %v1960_v12  ;;  %v1617_v12 = vld [vmem:[#allocation3 + $0x50] sm:$0xf]  ;;  %v1779_v17 = vld [vmem:[#allocation3 + $0x198] sm:$0xf0]  ;;  %v1915_v52 = vld [vmem:[#allocation3 + $0xa4] sm:$0xf] }
  0x26   :  { %869 = vmatpush.bf16.msra.mxu1 %v1968_v13  ;;  %2180 = vmatpush.bf16.msra.mxu3 %v1968_v13  ;;  %v1906_v13 = vld [vmem:[#allocation3 + $0x54] sm:$0xf0]  ;;  %v1782_v29 = vor.u32 %v1945_v16, %v1779_v17  ;;  %v1659_v53 = vld [vmem:[#allocation3 + $0xa8] sm:$0xf0] }
  0x27   :  { %v1618_v20 = vor.u32 %v1906_v13, %v1617_v12  ;;  %v1946_v13 = vld [vmem:[#allocation3 + $0x194] sm:$0xf0] }
  0x29   :  { %701 = vmatpush.bf16.msra.mxu0 %v1959_v14  ;;  %2173 = vmatpush.bf16.msra.mxu2 %v1959_v14  ;;  %v1745_v14 = vld [vmem:[#allocation3 + $0x150] sm:$0xf] }
  0x2a   :  { %870 = vmatpush.bf16.msra.mxu1 %v1967_v15  ;;  %2181 = vmatpush.bf16.msra.mxu3 %v1967_v15  ;;  %v1938_v15 = vld [vmem:[#allocation3 + $0x154] sm:$0xf0] }
  0x2b   :  { %v1746_v21 = vor.u32 %v1938_v15, %v1745_v14  ;;  %v1913_v14 = vld [vmem:[#allocation3 + $0x94] sm:$0xf]  ;;  %v1651_v15 = vld [vmem:[#allocation3 + $0x98] sm:$0xf0] }
  0x2c   :  { %702 = vmatmul.bf16.vlgmr.msra.gmra.mxu0 %v1578_v24  ;;  %782 = vmatmul.bf16.vlgmr.msra.gmra.mxu2 %v1706_v25  ;;  %v1625_v24 = vld [vmem:[#allocation3 + $0x60] sm:$0xf]  ;;  %v1908_v25 = vld [vmem:[#allocation3 + $0x64] sm:$0xf0] }
  0x2d   :  { %871 = vmatmul.bf16.vlgmr.msra.gmra.mxu1 %v1582_v26  ;;  %951 = vmatmul.bf16.vlgmr.msra.gmra.mxu3 %v1710_v27  ;;  %v1753_v26 = vld [vmem:[#allocation3 + $0x160] sm:$0xf]  ;;  %v1940_v27 = vld [vmem:[#allocation3 + $0x164] sm:$0xf0]  ;;  %v1626_v32 = vor.u32 %v1908_v25, %v1625_v24  ;;  %v1654_v24 = vor.u32 %v1913_v14, %v1651_v15 }
  0x2e   :  { %v1754_v33 = vor.u32 %v1940_v27, %v1753_v26 }
  0x3c   :  { %707 = vmatmul.bf16.gmra.mxu0 %v1586_v36  ;;  %787 = vmatmul.bf16.gmra.mxu2 %v1714_v37  ;;  %v1633_v36 = vld [vmem:[#allocation3 + $0x70] sm:$0xf]  ;;  %v1910_v37 = vld [vmem:[#allocation3 + $0x74] sm:$0xf0] }
  0x3d   :  { %876 = vmatmul.bf16.gmra.mxu1 %v1590_v38  ;;  %956 = vmatmul.bf16.gmra.mxu3 %v1718_v39  ;;  %v1761_v38 = vld [vmem:[#allocation3 + $0x170] sm:$0xf]  ;;  %v1942_v39 = vld [vmem:[#allocation3 + $0x174] sm:$0xf0]  ;;  %v1634_v44 = vor.u32 %v1910_v37, %v1633_v36 }
  0x3e   :  { %v1762_v45 = vor.u32 %v1942_v39, %v1761_v38 }
  0x4c   :  { %712 = vmatmul.bf16.gmra.mxu0 %v1594_v48  ;;  %792 = vmatmul.bf16.gmra.mxu2 %v1722_v49  ;;  %v1641_v48 = vld [vmem:[#allocation3 + $0x80] sm:$0xf]  ;;  %v1912_v49 = vld [vmem:[#allocation3 + $0x84] sm:$0xf0] }
  0x4d   :  { %881 = vmatmul.bf16.gmra.mxu1 %v1598_v50  ;;  %961 = vmatmul.bf16.gmra.mxu3 %v1726_v51  ;;  %v1769_v50 = vld [vmem:[#allocation3 + $0x180] sm:$0xf]  ;;  %v1944_v51 = vld [vmem:[#allocation3 + $0x184] sm:$0xf0]  ;;  %v1642_v56 = vor.u32 %v1912_v49, %v1641_v48 }
  0x4e   :  { %v1770_v57 = vor.u32 %v1944_v51, %v1769_v50  ;;  %v1785_v48 = vld [vmem:[#allocation3 + $0x1a0] sm:$0xf]  ;;  %v1948_v51 = vld [vmem:[#allocation3 + $0x1a4] sm:$0xf0] }
  0x5c   :  { %717 = vmatmul.bf16.gmra.mxu0 %v1602_v60  ;;  %797 = vmatmul.bf16.gmra.mxu2 %v1730_v61  ;;  %v1774_v60 = vor.u32 %v1943_v54, %v1771_v55  ;;  %v1947_v54 = vld [vmem:[#allocation3 + $0x1a4] sm:$0xf]  ;;  %v1787_v55 = vld [vmem:[#allocation3 + $0x1a8] sm:$0xf0] }
  0x5d   :  { %886 = vmatmul.bf16.gmra.mxu1 %v1606_v62  ;;  %966 = vmatmul.bf16.gmra.mxu3 %v1734_v63  ;;  %v2315_v63 = vld [vmem:[%s2450_s2] ss:$0 sm:$0xff] }
  0x6c   :  { %722 = vmatmul.bf16.gmra.mxu0 %v1610_v8  ;;  %802 = vmatmul.bf16.gmra.mxu2 %v1738_v9  ;;  %v1649_v8 = vld [vmem:[#allocation3 + $0x90] sm:$0xf]  ;;  %v1914_v9 = vld [vmem:[#allocation3 + $0x94] sm:$0xf0] }
  0x6d   :  { %891 = vmatmul.bf16.gmra.mxu1 %v1614_v10  ;;  %971 = vmatmul.bf16.gmra.mxu3 %v1742_v11  ;;  %v1777_v10 = vld [vmem:[#allocation3 + $0x190] sm:$0xf] }
  0x7c   :  { %727 = vmatmul.bf16.gmra.mxu0 %v1618_v20  ;;  %807 = vmatmul.bf16.gmra.mxu2 %v1746_v21 }
  0x7d   :  { %896 = vmatmul.bf16.gmra.mxu1 %v1622_v22  ;;  %976 = vmatmul.bf16.gmra.mxu3 %v1750_v23  ;;  %v1650_v22 = vor.u32 %v1914_v9, %v1649_v8  ;;  %v1778_v23 = vor.u32 %v1946_v13, %v1777_v10 }
  0x8c   :  { %732 = vmatmul.bf16.gmra.mxu0 %v1626_v32  ;;  %812 = vmatmul.bf16.gmra.mxu2 %v1754_v33 }
  0x8d   :  { %901 = vmatmul.bf16.gmra.mxu1 %v1630_v34  ;;  %981 = vmatmul.bf16.gmra.mxu3 %v1758_v35 }
  0x9c   :  { %737 = vmatmul.bf16.gmra.mxu0 %v1634_v44  ;;  %817 = vmatmul.bf16.gmra.mxu2 %v1762_v45 }
  0x9d   :  { %906 = vmatmul.bf16.gmra.mxu1 %v1638_v46  ;;  %986 = vmatmul.bf16.gmra.mxu3 %v1766_v47  ;;  %v1657_v46 = vld [vmem:[#allocation3 + $0xa0] sm:$0xf]  ;;  %v1916_v47 = vld [vmem:[#allocation3 + $0xa4] sm:$0xf0] }
  0xa9   :  { %v703_v58 = vpop.f32.mrf.mxu0 }
  0xaa   :  { %v872_v61 = vpop.f32.mrf.mxu1 }
  0xab   :  { %v873_v62 = vadd.f32 %v872_v61, %v703_v58  ;;  %v1786_v61 = vor.u32 %v1948_v51, %v1785_v48 }
  0xac   :  { %742 = vmatmul.bf16.gmra.mxu0 %v1642_v56  ;;  %822 = vmatmul.bf16.gmra.mxu2 %v1770_v57 }
  0xad   :  { %911 = vmatmul.bf16.gmra.mxu1 %v1646_v59  ;;  %991 = vmatmul.bf16.gmra.mxu3 %v1774_v60  ;;  %v1231_v2 = vmul.f32 %v2315_v63, %v873_v62  ;;  %v1658_v60 = vor.u32 %v1916_v47, %v1657_v46  ;;  %v1662_v62 = vor.u32 %v1915_v52, %v1659_v53 }
  0xaf   :  { %v783_v0 = vpop.f32.mrf.mxu2  ;;  %v1299_v11 = vadd.f32 %v2321_v3, %v1231_v2 }
  0xb0   :  { %v952_v1 = vpop.f32.mrf.mxu3 }
  0xb1   :  { %v705_v4 = vpop.f32.mrf.mxu0  ;;  %v953_v6 = vadd.f32 %v952_v1, %v783_v0  ;;  %v1363_v25 = vmax.f32 %v1299_v11, 0.0 }
  0xb2   :  { %v874_v5 = vpop.f32.mrf.mxu1 }
  0xb3   :  { %v875_v7 = vadd.f32 %v874_v5, %v705_v4  ;;  %v1263_v18 = vmul.f32 %v2315_v63, %v953_v6  ;;  %v1790_v5 = vor.u32 %v1947_v54, %v1787_v55 }
  0xb5   :  { %v1232_v12 = vmul.f32 %v2315_v63, %v875_v7  ;;  %v1331_v31 = vadd.f32 %v2321_v3, %v1263_v18 }
  0xb7   :  { %v1300_v19 = vadd.f32 %v2321_v3, %v1232_v12  ;;  %v785_v20 = vpop.f32.mrf.mxu2  ;;  %v1395_v36 = vmax.f32 %v1331_v31, 0.0  ;;  %v1795_v31 = vld [vmem:[#allocation3 + $0x1b8] sm:$0xf0] }
  0xb8   :  { %v954_v21 = vpop.f32.mrf.mxu3 }
  0xb9   :  { %v1364_v26 = vmax.f32 %v1300_v19, 0.0  ;;  %v955_v27 = vadd.f32 %v954_v21, %v785_v20  ;;  %v708_v28 = vpop.f32.mrf.mxu0 }
  0xba   :  { %v877_v30 = vpop.f32.mrf.mxu1 }
  0xbb   :  { %v1978_v32 = vpack.c.bf16 %v1364_v26, %v1363_v25  ;;  %v1264_v33 = vmul.f32 %v2315_v63, %v955_v27  ;;  %v878_v35 = vadd.f32 %v877_v30, %v708_v28  ;;  %v1950_v27 = vld [vmem:[#allocation3 + $0x1b4] sm:$0xf0]  ;;  %v1917_v28 = vld [vmem:[#allocation3 + $0xb4] sm:$0xf] }
  0xbc   :  { %747 = vmatmul.bf16.gmra.mxu0 %v1650_v22  ;;  %827 = vmatmul.bf16.gmra.mxu2 %v1778_v23  ;;  %v1665_v22 = vld [vmem:[#allocation3 + $0xb0] sm:$0xf]  ;;  %v1918_v23 = vld [vmem:[#allocation3 + $0xb4] sm:$0xf0]  ;;  %v1949_v30 = vld [vmem:[#allocation3 + $0x1b4] sm:$0xf] }
  0xbd   :  { %1979 = vst [vmem:[#allocation8] sm:$0xff] %v1978_v32   ;;  %v1332_v34 = vadd.f32 %v2321_v3, %v1264_v33  ;;  %916 = vmatmul.bf16.gmra.mxu1 %v1654_v24  ;;  %996 = vmatmul.bf16.gmra.mxu3 %v1782_v29  ;;  %v1233_v41 = vmul.f32 %v2315_v63, %v878_v35  ;;  %v1793_v24 = vld [vmem:[#allocation3 + $0x1b0] sm:$0xf]  ;;  %v1667_v29 = vld [vmem:[#allocation3 + $0xb8] sm:$0xf0] }
  0xbf   :  { %v1396_v37 = vmax.f32 %v1332_v34, 0.0  ;;  %v788_v38 = vpop.f32.mrf.mxu2  ;;  %v1301_v49 = vadd.f32 %v2321_v3, %v1233_v41 }
  0xc0   :  { %v957_v39 = vpop.f32.mrf.mxu3 }
  0xc1   :  { %v2058_v40 = vpack.c.bf16 %v1396_v37, %v1395_v36  ;;  %v710_v42 = vpop.f32.mrf.mxu0  ;;  %v958_v44 = vadd.f32 %v957_v39, %v788_v38  ;;  %v1365_v0 = vmax.f32 %v1301_v49, 0.0  ;;  %v1666_v36 = vor.u32 %v1918_v23, %v1665_v22 }
  0xc2   :  { %v879_v43 = vpop.f32.mrf.mxu1  ;;  %v1794_v37 = vor.u32 %v1950_v27, %v1793_v24  ;;  %v1670_v38 = vor.u32 %v1917_v28, %v1667_v29 }
  0xc3   :  { %2150 = vst [vmem:[#allocation8 + $0x80] sm:$0xff] %v2058_v40   ;;  %v880_v45 = vadd.f32 %v879_v43, %v710_v42  ;;  %v1265_v56 = vmul.f32 %v2315_v63, %v958_v44  ;;  %v1798_v43 = vor.u32 %v1949_v30, %v1795_v31 }
  0xc5   :  { %v1234_v50 = vmul.f32 %v2315_v63, %v880_v45  ;;  %v1333_v7 = vadd.f32 %v2321_v3, %v1265_v56 }
  0xc7   :  { %v1302_v57 = vadd.f32 %v2321_v3, %v1234_v50  ;;  %v790_v58 = vpop.f32.mrf.mxu2  ;;  %v1397_v12 = vmax.f32 %v1333_v7, 0.0  ;;  %v1803_v7 = vld [vmem:[#allocation3 + $0x1c8] sm:$0xf0] }
  0xc8   :  { %v959_v59 = vpop.f32.mrf.mxu3 }
  0xc9   :  { %v1366_v1 = vmax.f32 %v1302_v57, 0.0  ;;  %v960_v2 = vadd.f32 %v959_v59, %v790_v58  ;;  %v713_v4 = vpop.f32.mrf.mxu0 }
  0xca   :  { %v882_v6 = vpop.f32.mrf.mxu1 }
  0xcb   :  { %v1983_v8 = vpack.c.bf16 %v1366_v1, %v1365_v0  ;;  %v1266_v9 = vmul.f32 %v2315_v63, %v960_v2  ;;  %v883_v11 = vadd.f32 %v882_v6, %v713_v4  ;;  %v1952_v2 = vld [vmem:[#allocation3 + $0x1c4] sm:$0xf0]  ;;  %v1919_v4 = vld [vmem:[#allocation3 + $0xc4] sm:$0xf] }
  0xcc   :  { %752 = vmatmul.bf16.gmra.mxu0 %v1658_v60  ;;  %832 = vmatmul.bf16.gmra.mxu2 %v1786_v61  ;;  %v1673_v60 = vld [vmem:[#allocation3 + $0xc0] sm:$0xf]  ;;  %v1920_v61 = vld [vmem:[#allocation3 + $0xc4] sm:$0xf0]  ;;  %v1951_v6 = vld [vmem:[#allocation3 + $0x1c4] sm:$0xf] }
  0xcd   :  { %2135 = vst [vmem:[#allocation8 + $0x8] sm:$0xff] %v1983_v8   ;;  %v1334_v10 = vadd.f32 %v2321_v3, %v1266_v9  ;;  %921 = vmatmul.bf16.gmra.mxu1 %v1662_v62  ;;  %1001 = vmatmul.bf16.gmra.mxu3 %v1790_v5  ;;  %v1235_v17 = vmul.f32 %v2315_v63, %v883_v11  ;;  %v1801_v62 = vld [vmem:[#allocation3 + $0x1c0] sm:$0xf]  ;;  %v1675_v5 = vld [vmem:[#allocation3 + $0xc8] sm:$0xf0] }
  0xcf   :  { %v1398_v13 = vmax.f32 %v1334_v10, 0.0  ;;  %v793_v14 = vpop.f32.mrf.mxu2  ;;  %v1303_v25 = vadd.f32 %v2321_v3, %v1235_v17 }
  0xd0   :  { %v962_v15 = vpop.f32.mrf.mxu3 }
  0xd1   :  { %v2063_v16 = vpack.c.bf16 %v1398_v13, %v1397_v12  ;;  %v715_v18 = vpop.f32.mrf.mxu0  ;;  %v963_v20 = vadd.f32 %v962_v15, %v793_v14  ;;  %v1367_v39 = vmax.f32 %v1303_v25, 0.0  ;;  %v1674_v12 = vor.u32 %v1920_v61, %v1673_v60 }
  0xd2   :  { %v884_v19 = vpop.f32.mrf.mxu1  ;;  %v1802_v13 = vor.u32 %v1952_v2, %v1801_v62  ;;  %v1678_v14 = vor.u32 %v1919_v4, %v1675_v5 }
  0xd3   :  { %2151 = vst [vmem:[#allocation8 + $0x88] sm:$0xff] %v2063_v16   ;;  %v885_v21 = vadd.f32 %v884_v19, %v715_v18  ;;  %v1267_v32 = vmul.f32 %v2315_v63, %v963_v20  ;;  %v1806_v19 = vor.u32 %v1951_v6, %v1803_v7 }
  0xd5   :  { %v1236_v26 = vmul.f32 %v2315_v63, %v885_v21  ;;  %v1335_v45 = vadd.f32 %v2321_v3, %v1267_v32 }
  0xd7   :  { %v1304_v33 = vadd.f32 %v2321_v3, %v1236_v26  ;;  %v795_v34 = vpop.f32.mrf.mxu2  ;;  %v1399_v50 = vmax.f32 %v1335_v45, 0.0  ;;  %v1811_v45 = vld [vmem:[#allocation3 + $0x1d8] sm:$0xf0] }
  0xd8   :  { %v964_v35 = vpop.f32.mrf.mxu3 }
  0xd9   :  { %v1368_v40 = vmax.f32 %v1304_v33, 0.0  ;;  %v965_v41 = vadd.f32 %v964_v35, %v795_v34  ;;  %v718_v42 = vpop.f32.mrf.mxu0 }
  0xda   :  { %v887_v44 = vpop.f32.mrf.mxu1 }
  0xdb   :  { %v1988_v46 = vpack.c.bf16 %v1368_v40, %v1367_v39  ;;  %v1268_v47 = vmul.f32 %v2315_v63, %v965_v41  ;;  %v888_v49 = vadd.f32 %v887_v44, %v718_v42  ;;  %v1954_v41 = vld [vmem:[#allocation3 + $0x1d4] sm:$0xf0]  ;;  %v1921_v42 = vld [vmem:[#allocation3 + $0xd4] sm:$0xf] }
  0xdc   :  { %757 = vmatmul.bf16.gmra.mxu0 %v1666_v36  ;;  %837 = vmatmul.bf16.gmra.mxu2 %v1794_v37  ;;  %v1681_v36 = vld [vmem:[#allocation3 + $0xd0] sm:$0xf]  ;;  %v1922_v37 = vld [vmem:[#allocation3 + $0xd4] sm:$0xf0]  ;;  %v1953_v44 = vld [vmem:[#allocation3 + $0x1d4] sm:$0xf] }
  0xdd   :  { %2136 = vst [vmem:[#allocation8 + $0x10] sm:$0xff] %v1988_v46   ;;  %v1336_v48 = vadd.f32 %v2321_v3, %v1268_v47  ;;  %926 = vmatmul.bf16.gmra.mxu1 %v1670_v38  ;;  %1006 = vmatmul.bf16.gmra.mxu3 %v1798_v43  ;;  %v1237_v55 = vmul.f32 %v2315_v63, %v888_v49  ;;  %v1809_v38 = vld [vmem:[#allocation3 + $0x1d0] sm:$0xf]  ;;  %v1683_v43 = vld [vmem:[#allocation3 + $0xd8] sm:$0xf0] }
  0xdf   :  { %v1400_v51 = vmax.f32 %v1336_v48, 0.0  ;;  %v798_v52 = vpop.f32.mrf.mxu2  ;;  %v1305_v0 = vadd.f32 %v2321_v3, %v1237_v55 }
  0xe0   :  { %v967_v53 = vpop.f32.mrf.mxu3 }
  0xe1   :  { %v2068_v54 = vpack.c.bf16 %v1400_v51, %v1399_v50  ;;  %v720_v56 = vpop.f32.mrf.mxu0  ;;  %v968_v58 = vadd.f32 %v967_v53, %v798_v52  ;;  %v1369_v15 = vmax.f32 %v1305_v0, 0.0  ;;  %v1682_v50 = vor.u32 %v1922_v37, %v1681_v36 }
  0xe2   :  { %v889_v57 = vpop.f32.mrf.mxu1  ;;  %v1810_v51 = vor.u32 %v1954_v41, %v1809_v38  ;;  %v1686_v52 = vor.u32 %v1921_v42, %v1683_v43 }
  0xe3   :  { %2152 = vst [vmem:[#allocation8 + $0x90] sm:$0xff] %v2068_v54   ;;  %v890_v59 = vadd.f32 %v889_v57, %v720_v56  ;;  %v1269_v8 = vmul.f32 %v2315_v63, %v968_v58  ;;  %v1814_v57 = vor.u32 %v1953_v44, %v1811_v45 }
  0xe5   :  { %v1238_v1 = vmul.f32 %v2315_v63, %v890_v59  ;;  %v1337_v21 = vadd.f32 %v2321_v3, %v1269_v8 }
  0xe7   :  { %v1306_v9 = vadd.f32 %v2321_v3, %v1238_v1  ;;  %v800_v10 = vpop.f32.mrf.mxu2  ;;  %v1401_v26 = vmax.f32 %v1337_v21, 0.0  ;;  %v1819_v21 = vld [vmem:[#allocation3 + $0x1e8] sm:$0xf0] }
  0xe8   :  { %v969_v11 = vpop.f32.mrf.mxu3 }
  0xe9   :  { %v1370_v16 = vmax.f32 %v1306_v9, 0.0  ;;  %v970_v17 = vadd.f32 %v969_v11, %v800_v10  ;;  %v723_v18 = vpop.f32.mrf.mxu0 }
  0xea   :  { %v892_v20 = vpop.f32.mrf.mxu1 }
  0xeb   :  { %v1993_v22 = vpack.c.bf16 %v1370_v16, %v1369_v15  ;;  %v1270_v23 = vmul.f32 %v2315_v63, %v970_v17  ;;  %v893_v25 = vadd.f32 %v892_v20, %v723_v18  ;;  %v1956_v17 = vld [vmem:[#allocation3 + $0x1e4] sm:$0xf0]  ;;  %v1923_v18 = vld [vmem:[#allocation3 + $0xe4] sm:$0xf] }
  0xec   :  { %762 = vmatmul.bf16.gmra.mxu0 %v1674_v12  ;;  %842 = vmatmul.bf16.gmra.mxu2 %v1802_v13  ;;  %v1689_v12 = vld [vmem:[#allocation3 + $0xe0] sm:$0xf]  ;;  %v1924_v13 = vld [vmem:[#allocation3 + $0xe4] sm:$0xf0]  ;;  %v1955_v20 = vld [vmem:[#allocation3 + $0x1e4] sm:$0xf] }
  0xed   :  { %2137 = vst [vmem:[#allocation8 + $0x18] sm:$0xff] %v1993_v22   ;;  %v1338_v24 = vadd.f32 %v2321_v3, %v1270_v23  ;;  %931 = vmatmul.bf16.gmra.mxu1 %v1678_v14  ;;  %1011 = vmatmul.bf16.gmra.mxu3 %v1806_v19  ;;  %v1239_v31 = vmul.f32 %v2315_v63, %v893_v25  ;;  %v1817_v14 = vld [vmem:[#allocation3 + $0x1e0] sm:$0xf]  ;;  %v1691_v19 = vld [vmem:[#allocation3 + $0xe8] sm:$0xf0] }
  0xef   :  { %v1402_v27 = vmax.f32 %v1338_v24, 0.0  ;;  %v803_v28 = vpop.f32.mrf.mxu2  ;;  %v1307_v39 = vadd.f32 %v2321_v3, %v1239_v31 }
  0xf0   :  { %v972_v29 = vpop.f32.mrf.mxu3 }
  0xf1   :  { %v2073_v30 = vpack.c.bf16 %v1402_v27, %v1401_v26  ;;  %v725_v32 = vpop.f32.mrf.mxu0  ;;  %v973_v34 = vadd.f32 %v972_v29, %v803_v28  ;;  %v1371_v53 = vmax.f32 %v1307_v39, 0.0  ;;  %v1690_v26 = vor.u32 %v1924_v13, %v1689_v12 }
  0xf2   :  { %v894_v33 = vpop.f32.mrf.mxu1  ;;  %v1818_v27 = vor.u32 %v1956_v17, %v1817_v14  ;;  %v1694_v28 = vor.u32 %v1923_v18, %v1691_v19 }
  0xf3   :  { %2153 = vst [vmem:[#allocation8 + $0x98] sm:$0xff] %v2073_v30   ;;  %v895_v35 = vadd.f32 %v894_v33, %v725_v32  ;;  %v1271_v46 = vmul.f32 %v2315_v63, %v973_v34  ;;  %v1822_v33 = vor.u32 %v1955_v20, %v1819_v21 }
  0xf5   :  { %v1240_v40 = vmul.f32 %v2315_v63, %v895_v35  ;;  %v1339_v59 = vadd.f32 %v2321_v3, %v1271_v46 }
  0xf7   :  { %v1308_v47 = vadd.f32 %v2321_v3, %v1240_v40  ;;  %v805_v48 = vpop.f32.mrf.mxu2  ;;  %v1403_v1 = vmax.f32 %v1339_v59, 0.0  ;;  %v1827_v59 = vld [vmem:[#allocation3 + $0x1f8] sm:$0xf0] }
  0xf8   :  { %v974_v49 = vpop.f32.mrf.mxu3 }
  0xf9   :  { %v1372_v54 = vmax.f32 %v1308_v47, 0.0  ;;  %v975_v55 = vadd.f32 %v974_v49, %v805_v48  ;;  %v728_v56 = vpop.f32.mrf.mxu0 }
  0xfa   :  { %v897_v58 = vpop.f32.mrf.mxu1 }
  0xfb   :  { %v1998_v60 = vpack.c.bf16 %v1372_v54, %v1371_v53  ;;  %v1272_v61 = vmul.f32 %v2315_v63, %v975_v55  ;;  %v898_v0 = vadd.f32 %v897_v58, %v728_v56  ;;  %v1958_v55 = vld [vmem:[#allocation3 + $0x1f4] sm:$0xf0]  ;;  %v1925_v56 = vld [vmem:[#allocation3 + $0xf4] sm:$0xf] }
  0xfc   :  { %767 = vmatmul.bf16.gmra.mxu0 %v1682_v50  ;;  %847 = vmatmul.bf16.gmra.mxu2 %v1810_v51  ;;  %v1697_v50 = vld [vmem:[#allocation3 + $0xf0] sm:$0xf]  ;;  %v1926_v51 = vld [vmem:[#allocation3 + $0xf4] sm:$0xf0]  ;;  %v1957_v58 = vld [vmem:[#allocation3 + $0x1f4] sm:$0xf] }
  0xfd   :  { %2138 = vst [vmem:[#allocation8 + $0x20] sm:$0xff] %v1998_v60   ;;  %v1340_v62 = vadd.f32 %v2321_v3, %v1272_v61  ;;  %936 = vmatmul.bf16.gmra.mxu1 %v1686_v52  ;;  %1016 = vmatmul.bf16.gmra.mxu3 %v1814_v57  ;;  %v1241_v7 = vmul.f32 %v2315_v63, %v898_v0  ;;  %v1825_v52 = vld [vmem:[#allocation3 + $0x1f0] sm:$0xf]  ;;  %v1699_v57 = vld [vmem:[#allocation3 + $0xf8] sm:$0xf0] }
  0xff   :  { %v1404_v2 = vmax.f32 %v1340_v62, 0.0  ;;  %v808_v4 = vpop.f32.mrf.mxu2  ;;  %v1309_v15 = vadd.f32 %v2321_v3, %v1241_v7 }
 0x100   :  { %v977_v5 = vpop.f32.mrf.mxu3 }
 0x101   :  { %v2078_v6 = vpack.c.bf16 %v1404_v2, %v1403_v1  ;;  %v730_v8 = vpop.f32.mrf.mxu0  ;;  %v978_v10 = vadd.f32 %v977_v5, %v808_v4  ;;  %v1373_v29 = vmax.f32 %v1309_v15, 0.0  ;;  %v1698_v1 = vor.u32 %v1926_v51, %v1697_v50 }
 0x102   :  { %v899_v9 = vpop.f32.mrf.mxu1  ;;  %v1826_v2 = vor.u32 %v1958_v55, %v1825_v52  ;;  %v1702_v4 = vor.u32 %v1925_v56, %v1699_v57 }
 0x103   :  { %2154 = vst [vmem:[#allocation8 + $0xa0] sm:$0xff] %v2078_v6   ;;  %v900_v11 = vadd.f32 %v899_v9, %v730_v8  ;;  %v1273_v22 = vmul.f32 %v2315_v63, %v978_v10  ;;  %v1830_v9 = vor.u32 %v1957_v58, %v1827_v59 }
 0x105   :  { %v1242_v16 = vmul.f32 %v2315_v63, %v900_v11  ;;  %v1341_v35 = vadd.f32 %v2321_v3, %v1273_v22 }
 0x107   :  { %v1310_v23 = vadd.f32 %v2321_v3, %v1242_v16  ;;  %v810_v24 = vpop.f32.mrf.mxu2  ;;  %v1405_v40 = vmax.f32 %v1341_v35, 0.0 }
 0x108   :  { %v979_v25 = vpop.f32.mrf.mxu3 }
 0x109   :  { %v1374_v30 = vmax.f32 %v1310_v23, 0.0  ;;  %v980_v31 = vadd.f32 %v979_v25, %v810_v24  ;;  %v733_v32 = vpop.f32.mrf.mxu0 }
 0x10a   :  { %v902_v34 = vpop.f32.mrf.mxu1 }
 0x10b   :  { %v2003_v36 = vpack.c.bf16 %v1374_v30, %v1373_v29  ;;  %v1274_v37 = vmul.f32 %v2315_v63, %v980_v31  ;;  %v903_v39 = vadd.f32 %v902_v34, %v733_v32 }
 0x10c   :  { %772 = vmatmul.bf16.gmra.mxu0 %v1690_v26  ;;  %852 = vmatmul.bf16.gmra.mxu2 %v1818_v27 }
 0x10d   :  { %2139 = vst [vmem:[#allocation8 + $0x28] sm:$0xff] %v2003_v36   ;;  %v1342_v38 = vadd.f32 %v2321_v3, %v1274_v37  ;;  %941 = vmatmul.bf16.gmra.mxu1 %v1694_v28  ;;  %1021 = vmatmul.bf16.gmra.mxu3 %v1822_v33  ;;  %v1243_v45 = vmul.f32 %v2315_v63, %v903_v39 }
 0x10f   :  { %v1406_v41 = vmax.f32 %v1342_v38, 0.0  ;;  %v813_v42 = vpop.f32.mrf.mxu2  ;;  %v1311_v53 = vadd.f32 %v2321_v3, %v1243_v45 }
 0x110   :  { %v982_v43 = vpop.f32.mrf.mxu3 }
 0x111   :  { %v2083_v44 = vpack.c.bf16 %v1406_v41, %v1405_v40  ;;  %v735_v46 = vpop.f32.mrf.mxu0  ;;  %v983_v48 = vadd.f32 %v982_v43, %v813_v42  ;;  %v1375_v5 = vmax.f32 %v1311_v53, 0.0 }
 0x112   :  { %v904_v47 = vpop.f32.mrf.mxu1 }
 0x113   :  { %2155 = vst [vmem:[#allocation8 + $0xa8] sm:$0xff] %v2083_v44   ;;  %v905_v49 = vadd.f32 %v904_v47, %v735_v46  ;;  %v1275_v60 = vmul.f32 %v2315_v63, %v983_v48 }
 0x115   :  { %v1244_v54 = vmul.f32 %v2315_v63, %v905_v49  ;;  %v1343_v11 = vadd.f32 %v2321_v3, %v1275_v60 }
 0x117   :  { %v1312_v61 = vadd.f32 %v2321_v3, %v1244_v54  ;;  %v815_v62 = vpop.f32.mrf.mxu2  ;;  %v1407_v16 = vmax.f32 %v1343_v11, 0.0 }
 0x118   :  { %v984_v0 = vpop.f32.mrf.mxu3 }
 0x119   :  { %v1376_v6 = vmax.f32 %v1312_v61, 0.0  ;;  %v985_v7 = vadd.f32 %v984_v0, %v815_v62  ;;  %v738_v8 = vpop.f32.mrf.mxu0 }
 0x11a   :  { %v907_v10 = vpop.f32.mrf.mxu1 }
 0x11b   :  { %v2008_v12 = vpack.c.bf16 %v1376_v6, %v1375_v5  ;;  %v1276_v13 = vmul.f32 %v2315_v63, %v985_v7  ;;  %v908_v15 = vadd.f32 %v907_v10, %v738_v8 }
 0x11c   :  { %777 = vmatmul.bf16.gmra.mxu0 %v1698_v1  ;;  %857 = vmatmul.bf16.gmra.mxu2 %v1826_v2 }
 0x11d   :  { %2140 = vst [vmem:[#allocation8 + $0x30] sm:$0xff] %v2008_v12   ;;  %v1344_v14 = vadd.f32 %v2321_v3, %v1276_v13  ;;  %946 = vmatmul.bf16.gmra.mxu1 %v1702_v4  ;;  %1026 = vmatmul.bf16.gmra.mxu3 %v1830_v9  ;;  %v1245_v21 = vmul.f32 %v2315_v63, %v908_v15 }
 0x11f   :  { %v1408_v17 = vmax.f32 %v1344_v14, 0.0  ;;  %v818_v18 = vpop.f32.mrf.mxu2  ;;  %v1313_v26 = vadd.f32 %v2321_v3, %v1245_v21 }
 0x120   :  { %v987_v19 = vpop.f32.mrf.mxu3 }
 0x121   :  { %v2088_v20 = vpack.c.bf16 %v1408_v17, %v1407_v16  ;;  %v740_v22 = vpop.f32.mrf.mxu0  ;;  %v988_v24 = vadd.f32 %v987_v19, %v818_v18  ;;  %v1377_v32 = vmax.f32 %v1313_v26, 0.0 }
 0x122   :  { %v909_v23 = vpop.f32.mrf.mxu1 }
 0x123   :  { %2156 = vst [vmem:[#allocation8 + $0xb0] sm:$0xff] %v2088_v20   ;;  %v910_v25 = vadd.f32 %v909_v23, %v740_v22  ;;  %v1277_v28 = vmul.f32 %v2315_v63, %v988_v24 }
 0x125   :  { %v1246_v27 = vmul.f32 %v2315_v63, %v910_v25  ;;  %v1345_v37 = vadd.f32 %v2321_v3, %v1277_v28 }
 0x127   :  { %v1314_v29 = vadd.f32 %v2321_v3, %v1246_v27  ;;  %v820_v30 = vpop.f32.mrf.mxu2  ;;  %v1409_v42 = vmax.f32 %v1345_v37, 0.0 }
 0x128   :  { %v989_v31 = vpop.f32.mrf.mxu3 }
 0x129   :  { %v1378_v33 = vmax.f32 %v1314_v29, 0.0  ;;  %v990_v34 = vadd.f32 %v989_v31, %v820_v30  ;;  %v743_v35 = vpop.f32.mrf.mxu0 }
 0x12a   :  { %v912_v36 = vpop.f32.mrf.mxu1 }
 0x12b   :  { %v2013_v38 = vpack.c.bf16 %v1378_v33, %v1377_v32  ;;  %v1278_v39 = vmul.f32 %v2315_v63, %v990_v34  ;;  %v913_v41 = vadd.f32 %v912_v36, %v743_v35 }
 0x12d   :  { %2141 = vst [vmem:[#allocation8 + $0x38] sm:$0xff] %v2013_v38   ;;  %v1346_v40 = vadd.f32 %v2321_v3, %v1278_v39  ;;  %v1247_v47 = vmul.f32 %v2315_v63, %v913_v41 }
 0x12f   :  { %v1410_v43 = vmax.f32 %v1346_v40, 0.0  ;;  %v823_v44 = vpop.f32.mrf.mxu2  ;;  %v1315_v52 = vadd.f32 %v2321_v3, %v1247_v47 }
 0x130   :  { %v992_v45 = vpop.f32.mrf.mxu3 }
 0x131   :  { %v2093_v46 = vpack.c.bf16 %v1410_v43, %v1409_v42  ;;  %v745_v48 = vpop.f32.mrf.mxu0  ;;  %v993_v50 = vadd.f32 %v992_v45, %v823_v44  ;;  %v1379_v58 = vmax.f32 %v1315_v52, 0.0 }
 0x132   :  { %v914_v49 = vpop.f32.mrf.mxu1 }
 0x133   :  { %2157 = vst [vmem:[#allocation8 + $0xb8] sm:$0xff] %v2093_v46   ;;  %v915_v51 = vadd.f32 %v914_v49, %v745_v48  ;;  %v1279_v54 = vmul.f32 %v2315_v63, %v993_v50 }
 0x135   :  { %v1248_v53 = vmul.f32 %v2315_v63, %v915_v51  ;;  %v1347_v0 = vadd.f32 %v2321_v3, %v1279_v54 }
 0x137   :  { %v1316_v55 = vadd.f32 %v2321_v3, %v1248_v53  ;;  %v825_v56 = vpop.f32.mrf.mxu2  ;;  %v1411_v6 = vmax.f32 %v1347_v0, 0.0 }
 0x138   :  { %v994_v57 = vpop.f32.mrf.mxu3 }
 0x139   :  { %v1380_v59 = vmax.f32 %v1316_v55, 0.0  ;;  %v995_v60 = vadd.f32 %v994_v57, %v825_v56  ;;  %v748_v61 = vpop.f32.mrf.mxu0 }
 0x13a   :  { %v917_v62 = vpop.f32.mrf.mxu1 }
 0x13b   :  { %v2018_v1 = vpack.c.bf16 %v1380_v59, %v1379_v58  ;;  %v1280_v2 = vmul.f32 %v2315_v63, %v995_v60  ;;  %v918_v5 = vadd.f32 %v917_v62, %v748_v61 }
 0x13d   :  { %2142 = vst [vmem:[#allocation8 + $0x40] sm:$0xff] %v2018_v1   ;;  %v1348_v4 = vadd.f32 %v2321_v3, %v1280_v2  ;;  %v1249_v11 = vmul.f32 %v2315_v63, %v918_v5 }
 0x13f   :  { %v1412_v7 = vmax.f32 %v1348_v4, 0.0  ;;  %v828_v8 = vpop.f32.mrf.mxu2  ;;  %v1317_v16 = vadd.f32 %v2321_v3, %v1249_v11 }
 0x140   :  { %v997_v9 = vpop.f32.mrf.mxu3 }
 0x141   :  { %v2098_v10 = vpack.c.bf16 %v1412_v7, %v1411_v6  ;;  %v750_v12 = vpop.f32.mrf.mxu0  ;;  %v998_v14 = vadd.f32 %v997_v9, %v828_v8  ;;  %v1381_v22 = vmax.f32 %v1317_v16, 0.0 }
 0x142   :  { %v919_v13 = vpop.f32.mrf.mxu1 }
 0x143   :  { %2158 = vst [vmem:[#allocation8 + $0xc0] sm:$0xff] %v2098_v10   ;;  %v920_v15 = vadd.f32 %v919_v13, %v750_v12  ;;  %v1281_v18 = vmul.f32 %v2315_v63, %v998_v14 }
 0x145   :  { %v1250_v17 = vmul.f32 %v2315_v63, %v920_v15  ;;  %v1349_v27 = vadd.f32 %v2321_v3, %v1281_v18 }
 0x147   :  { %v1318_v19 = vadd.f32 %v2321_v3, %v1250_v17  ;;  %v830_v20 = vpop.f32.mrf.mxu2  ;;  %v1413_v32 = vmax.f32 %v1349_v27, 0.0 }
 0x148   :  { %v999_v21 = vpop.f32.mrf.mxu3 }
 0x149   :  { %v1382_v23 = vmax.f32 %v1318_v19, 0.0  ;;  %v1000_v24 = vadd.f32 %v999_v21, %v830_v20  ;;  %v753_v25 = vpop.f32.mrf.mxu0 }
 0x14a   :  { %v922_v26 = vpop.f32.mrf.mxu1 }
 0x14b   :  { %v2023_v28 = vpack.c.bf16 %v1382_v23, %v1381_v22  ;;  %v1282_v29 = vmul.f32 %v2315_v63, %v1000_v24  ;;  %v923_v31 = vadd.f32 %v922_v26, %v753_v25 }
 0x14d   :  { %2143 = vst [vmem:[#allocation8 + $0x48] sm:$0xff] %v2023_v28   ;;  %v1350_v30 = vadd.f32 %v2321_v3, %v1282_v29  ;;  %v1251_v37 = vmul.f32 %v2315_v63, %v923_v31 }
 0x14f   :  { %v1414_v33 = vmax.f32 %v1350_v30, 0.0  ;;  %v833_v34 = vpop.f32.mrf.mxu2  ;;  %v1319_v42 = vadd.f32 %v2321_v3, %v1251_v37 }
 0x150   :  { %v1002_v35 = vpop.f32.mrf.mxu3 }
 0x151   :  { %v2103_v36 = vpack.c.bf16 %v1414_v33, %v1413_v32  ;;  %v755_v38 = vpop.f32.mrf.mxu0  ;;  %v1003_v40 = vadd.f32 %v1002_v35, %v833_v34  ;;  %v1383_v48 = vmax.f32 %v1319_v42, 0.0 }
 0x152   :  { %v924_v39 = vpop.f32.mrf.mxu1 }
 0x153   :  { %2159 = vst [vmem:[#allocation8 + $0xc8] sm:$0xff] %v2103_v36   ;;  %v925_v41 = vadd.f32 %v924_v39, %v755_v38  ;;  %v1283_v44 = vmul.f32 %v2315_v63, %v1003_v40 }
 0x155   :  { %v1252_v43 = vmul.f32 %v2315_v63, %v925_v41  ;;  %v1351_v53 = vadd.f32 %v2321_v3, %v1283_v44 }
 0x157   :  { %v1320_v45 = vadd.f32 %v2321_v3, %v1252_v43  ;;  %v835_v46 = vpop.f32.mrf.mxu2  ;;  %v1415_v58 = vmax.f32 %v1351_v53, 0.0 }
 0x158   :  { %v1004_v47 = vpop.f32.mrf.mxu3 }
 0x159   :  { %v1384_v49 = vmax.f32 %v1320_v45, 0.0  ;;  %v1005_v50 = vadd.f32 %v1004_v47, %v835_v46  ;;  %v758_v51 = vpop.f32.mrf.mxu0 }
 0x15a   :  { %v927_v52 = vpop.f32.mrf.mxu1 }
 0x15b   :  { %v2028_v54 = vpack.c.bf16 %v1384_v49, %v1383_v48  ;;  %v1284_v55 = vmul.f32 %v2315_v63, %v1005_v50  ;;  %v928_v57 = vadd.f32 %v927_v52, %v758_v51 }
 0x15d   :  { %2144 = vst [vmem:[#allocation8 + $0x50] sm:$0xff] %v2028_v54   ;;  %v1352_v56 = vadd.f32 %v2321_v3, %v1284_v55  ;;  %v1253_v0 = vmul.f32 %v2315_v63, %v928_v57 }
 0x15f   :  { %v1416_v59 = vmax.f32 %v1352_v56, 0.0  ;;  %v838_v60 = vpop.f32.mrf.mxu2  ;;  %v1321_v6 = vadd.f32 %v2321_v3, %v1253_v0 }
 0x160   :  { %v1007_v61 = vpop.f32.mrf.mxu3 }
 0x161   :  { %v2108_v62 = vpack.c.bf16 %v1416_v59, %v1415_v58  ;;  %v760_v1 = vpop.f32.mrf.mxu0  ;;  %v1008_v4 = vadd.f32 %v1007_v61, %v838_v60  ;;  %v1385_v12 = vmax.f32 %v1321_v6, 0.0 }
 0x162   :  { %v929_v2 = vpop.f32.mrf.mxu1 }
 0x163   :  { %2160 = vst [vmem:[#allocation8 + $0xd0] sm:$0xff] %v2108_v62   ;;  %v930_v5 = vadd.f32 %v929_v2, %v760_v1  ;;  %v1285_v8 = vmul.f32 %v2315_v63, %v1008_v4 }
 0x165   :  { %v1254_v7 = vmul.f32 %v2315_v63, %v930_v5  ;;  %v1353_v17 = vadd.f32 %v2321_v3, %v1285_v8 }
 0x167   :  { %v1322_v9 = vadd.f32 %v2321_v3, %v1254_v7  ;;  %v840_v10 = vpop.f32.mrf.mxu2  ;;  %v1417_v22 = vmax.f32 %v1353_v17, 0.0 }
 0x168   :  { %v1009_v11 = vpop.f32.mrf.mxu3 }
 0x169   :  { %v1386_v13 = vmax.f32 %v1322_v9, 0.0  ;;  %v1010_v14 = vadd.f32 %v1009_v11, %v840_v10  ;;  %v763_v15 = vpop.f32.mrf.mxu0 }
 0x16a   :  { %v932_v16 = vpop.f32.mrf.mxu1 }
 0x16b   :  { %v2033_v18 = vpack.c.bf16 %v1386_v13, %v1385_v12  ;;  %v1286_v19 = vmul.f32 %v2315_v63, %v1010_v14  ;;  %v933_v21 = vadd.f32 %v932_v16, %v763_v15 }
 0x16d   :  { %2145 = vst [vmem:[#allocation8 + $0x58] sm:$0xff] %v2033_v18   ;;  %v1354_v20 = vadd.f32 %v2321_v3, %v1286_v19  ;;  %v1255_v27 = vmul.f32 %v2315_v63, %v933_v21 }
 0x16f   :  { %v1418_v23 = vmax.f32 %v1354_v20, 0.0  ;;  %v843_v24 = vpop.f32.mrf.mxu2  ;;  %v1323_v32 = vadd.f32 %v2321_v3, %v1255_v27 }
 0x170   :  { %v1012_v25 = vpop.f32.mrf.mxu3 }
 0x171   :  { %v2113_v26 = vpack.c.bf16 %v1418_v23, %v1417_v22  ;;  %v765_v28 = vpop.f32.mrf.mxu0  ;;  %v1013_v30 = vadd.f32 %v1012_v25, %v843_v24  ;;  %v1387_v38 = vmax.f32 %v1323_v32, 0.0  ;;  %v2191_v23 = vld [vmem:[%s2450_s2] ss:$0 sm:$0xff]  ;;  %s2277_s2 = smov [#allocation8]  }
 0x172   :  { %v934_v29 = vpop.f32.mrf.mxu1 }
 0x173   :  { %2161 = vst [vmem:[#allocation8 + $0xd8] sm:$0xff] %v2113_v26   ;;  %v935_v31 = vadd.f32 %v934_v29, %v765_v28  ;;  %v1287_v34 = vmul.f32 %v2315_v63, %v1013_v30  ;;  %v2192_v26 = vld [vmem:[%s2451_s3] ss:$0 sm:$0xff]  ;;  %s1559_s3 = sshll.u32 %s2277_s2, 4  ;;  %s1560_s3 = int_to_ptr.vmem [resolvable:$true] %s1559_s3 }
 0x175   :  { %v1256_v33 = vmul.f32 %v2315_v63, %v935_v31  ;;  %v1355_v43 = vadd.f32 %v2321_v3, %v1287_v34 }
 0x177   :  { %v1324_v35 = vadd.f32 %v2321_v3, %v1256_v33  ;;  %v845_v36 = vpop.f32.mrf.mxu2  ;;  %v1419_v48 = vmax.f32 %v1355_v43, 0.0 }
 0x178   :  { %v1014_v37 = vpop.f32.mrf.mxu3 }
 0x179   :  { %v1388_v39 = vmax.f32 %v1324_v35, 0.0  ;;  %v1015_v40 = vadd.f32 %v1014_v37, %v845_v36  ;;  %v768_v41 = vpop.f32.mrf.mxu0 }
 0x17a   :  { %v937_v42 = vpop.f32.mrf.mxu1 }
 0x17b   :  { %v2038_v44 = vpack.c.bf16 %v1388_v39, %v1387_v38  ;;  %v1288_v45 = vmul.f32 %v2315_v63, %v1015_v40  ;;  %v938_v47 = vadd.f32 %v937_v42, %v768_v41 }
 0x17d   :  { %2146 = vst [vmem:[#allocation8 + $0x60] sm:$0xff] %v2038_v44   ;;  %v1356_v46 = vadd.f32 %v2321_v3, %v1288_v45  ;;  %v1257_v53 = vmul.f32 %v2315_v63, %v938_v47 }
 0x17f   :  { %v1420_v49 = vmax.f32 %v1356_v46, 0.0  ;;  %v848_v50 = vpop.f32.mrf.mxu2  ;;  %v1325_v58 = vadd.f32 %v2321_v3, %v1257_v53 }
 0x180   :  { %v1017_v51 = vpop.f32.mrf.mxu3 }
 0x181   :  { %v2118_v52 = vpack.c.bf16 %v1420_v49, %v1419_v48  ;;  %v770_v54 = vpop.f32.mrf.mxu0  ;;  %v1018_v56 = vadd.f32 %v1017_v51, %v848_v50  ;;  %v1389_v1 = vmax.f32 %v1325_v58, 0.0 }
 0x182   :  { %v939_v55 = vpop.f32.mrf.mxu1 }
 0x183   :  { %2162 = vst [vmem:[#allocation8 + $0xe0] sm:$0xff] %v2118_v52   ;;  %v940_v57 = vadd.f32 %v939_v55, %v770_v54  ;;  %v1289_v60 = vmul.f32 %v2315_v63, %v1018_v56 }
 0x185   :  { %v1258_v59 = vmul.f32 %v2315_v63, %v940_v57  ;;  %v1357_v7 = vadd.f32 %v2321_v3, %v1289_v60 }
 0x187   :  { %v1326_v61 = vadd.f32 %v2321_v3, %v1258_v59  ;;  %v850_v62 = vpop.f32.mrf.mxu2  ;;  %v1421_v12 = vmax.f32 %v1357_v7, 0.0 }
 0x188   :  { %v1019_v0 = vpop.f32.mrf.mxu3 }
 0x189   :  { %v1390_v2 = vmax.f32 %v1326_v61, 0.0  ;;  %v1020_v4 = vadd.f32 %v1019_v0, %v850_v62  ;;  %v773_v5 = vpop.f32.mrf.mxu0 }
 0x18a   :  { %v942_v6 = vpop.f32.mrf.mxu1 }
 0x18b   :  { %v2043_v8 = vpack.c.bf16 %v1390_v2, %v1389_v1  ;;  %v1290_v9 = vmul.f32 %v2315_v63, %v1020_v4  ;;  %v943_v11 = vadd.f32 %v942_v6, %v773_v5 }
 0x18d   :  { %2147 = vst [vmem:[#allocation8 + $0x68] sm:$0xff] %v2043_v8   ;;  %v1358_v10 = vadd.f32 %v2321_v3, %v1290_v9  ;;  %v1259_v17 = vmul.f32 %v2315_v63, %v943_v11 }
 0x18f   :  { %v1422_v13 = vmax.f32 %v1358_v10, 0.0  ;;  %v853_v14 = vpop.f32.mrf.mxu2  ;;  %v1327_v22 = vadd.f32 %v2321_v3, %v1259_v17 }
 0x190   :  { %v1022_v15 = vpop.f32.mrf.mxu3 }
 0x191   :  { %v2123_v16 = vpack.c.bf16 %v1422_v13, %v1421_v12  ;;  %v775_v18 = vpop.f32.mrf.mxu0  ;;  %v1023_v20 = vadd.f32 %v1022_v15, %v853_v14  ;;  %v1391_v29 = vmax.f32 %v1327_v22, 0.0 }
 0x192   :  { %v944_v19 = vpop.f32.mrf.mxu1 }
 0x193   :  { %2163 = vst [vmem:[#allocation8 + $0xe8] sm:$0xff] %v2123_v16   ;;  %v945_v21 = vadd.f32 %v944_v19, %v775_v18  ;;  %v1291_v25 = vmul.f32 %v2191_v23, %v1023_v20 }
 0x195   :  { %v1260_v24 = vmul.f32 %v2191_v23, %v945_v21  ;;  %v1359_v34 = vadd.f32 %v2192_v26, %v1291_v25 }
 0x197   :  { %v1328_v27 = vadd.f32 %v2192_v26, %v1260_v24  ;;  %v855_v28 = vpop.f32.mrf.mxu2  ;;  %v1423_v38 = vmax.f32 %v1359_v34, 0.0 }
 0x198   :  { %v1024_v63 = vpop.f32.mrf.mxu3 }
 0x199   :  { %v1392_v30 = vmax.f32 %v1328_v27, 0.0  ;;  %v1025_v31 = vadd.f32 %v1024_v63, %v855_v28  ;;  %v778_v32 = vpop.f32.mrf.mxu0 }
 0x19a   :  { %v947_v33 = vpop.f32.mrf.mxu1 }
 0x19b   :  { %v2048_v3 = vpack.c.bf16 %v1392_v30, %v1391_v29  ;;  %v1292_v35 = vmul.f32 %v2191_v23, %v1025_v31  ;;  %v948_v37 = vadd.f32 %v947_v33, %v778_v32 }
 0x19d   :  { %2148 = vst [vmem:[#allocation8 + $0x70] sm:$0xff] %v2048_v3   ;;  %v1360_v36 = vadd.f32 %v2192_v26, %v1292_v35  ;;  %v1261_v43 = vmul.f32 %v2191_v23, %v948_v37 }
 0x19f   :  { %v1424_v39 = vmax.f32 %v1360_v36, 0.0  ;;  %v858_v40 = vpop.f32.mrf.mxu2  ;;  %v1329_v48 = vadd.f32 %v2192_v26, %v1261_v43 }
 0x1a0   :  { %v1027_v41 = vpop.f32.mrf.mxu3 }
 0x1a1   :  { %v2128_v42 = vpack.c.bf16 %v1424_v39, %v1423_v38  ;;  %v780_v44 = vpop.f32.mrf.mxu0  ;;  %v1028_v46 = vadd.f32 %v1027_v41, %v858_v40  ;;  %v1393_v54 = vmax.f32 %v1329_v48, 0.0 }
 0x1a2   :  { %v949_v45 = vpop.f32.mrf.mxu1 }
 0x1a3   :  { %2164 = vst [vmem:[#allocation8 + $0xf0] sm:$0xff] %v2128_v42   ;;  %v950_v47 = vadd.f32 %v949_v45, %v780_v44  ;;  %v1293_v50 = vmul.f32 %v2191_v23, %v1028_v46 }
 0x1a5   :  { %v1262_v49 = vmul.f32 %v2191_v23, %v950_v47  ;;  %v1361_v57 = vadd.f32 %v2192_v26, %v1293_v50 }
 0x1a7   :  { %v1330_v51 = vadd.f32 %v2192_v26, %v1262_v49  ;;  %v860_v52 = vpop.f32.mrf.mxu2  ;;  %v1425_v61 = vmax.f32 %v1361_v57, 0.0 }
 0x1a8   :  { %v1029_v53 = vpop.f32.mrf.mxu3 }
 0x1a9   :  { %v1394_v55 = vmax.f32 %v1330_v51, 0.0  ;;  %v1030_v56 = vadd.f32 %v1029_v53, %v860_v52 }
 0x1ab   :  { %v2053_v58 = vpack.c.bf16 %v1394_v55, %v1393_v54  ;;  %v1294_v59 = vmul.f32 %v2191_v23, %v1030_v56 }
 0x1ad   :  { %2149 = vst [vmem:[#allocation8 + $0x78] sm:$0xff] %v2053_v58   ;;  %v1362_v60 = vadd.f32 %v2192_v26, %v1294_v59 }
 0x1af   :  { %v1426_v62 = vmax.f32 %v1362_v60, 0.0 }
 0x1b1   :  { %v2133_v0 = vpack.c.bf16 %v1426_v62, %v1425_v61 }
 0x1b3   :  { %2165 = vst [vmem:[#allocation8 + $0xf8] sm:$0xff] %v2133_v0  }
 0x1b4   :  { %1567 = dma.vmem_to_hbm [thread:$0]  %s1560_s3, 4096, %s1562_s11, [#allocation5], %s2275_s27, %s2275_s27, %s2276_s28  }
 0x1b5   :  { %2269 = dma.done.wait [#allocation5], 4096  }
 0x1b6   :  { %2270 = vsyncadd [#allocation5], 4294963200 }
 0x1b7   :  { %1572 = vsyncpa [#allocation4], 1 }
 0x1b8   :  { %1573 = vsyncpa [#allocation7], 1 }
 0x1b9   :  { %1574 = vsyncpa [#allocation5], 1 }

</bundles_post_ra>
